<compile_context>
chip_gen: v7x
topology: tpu7x:2x2x1
jax: 0.10.0
libtpu: 0.0.40
codegen_flags: <defaults>
</compile_context>

<pallas_src>
import functools

import jax
import jax.numpy as jnp
from jax import lax
from jax.experimental import pallas as pl
from jax.experimental.pallas import tpu as pltpu

EPS = 1e-5
BF16 = jnp.bfloat16


# ---------------------------------------------------------------------------
# In-kernel helpers
# ---------------------------------------------------------------------------
def _conv3_taps(x_bf16_2d, w_ref, tb, L, Cout):
    """k=3, pad=1 Conv1d (channels-last, bias-free) as 3 flat MXU matmuls.

    x_bf16_2d: (tb*L, Cin) bf16; w_ref: (3, Cin, Cout) bf16, tap-major.
    Returns (tb, L, Cout) f32.

    Tap-by-tap accumulation; the halo is handled with pltpu.roll (XLU sublane rotate)
    + an iota mask on the boundary rows, so no concat/slice copies are materialized.
    """
    pos = lax.broadcasted_iota(jnp.int32, (tb, L, Cout), 1)

    # centre tap: out[l] += x[l] @ w[1]
    acc = jnp.dot(x_bf16_2d, w_ref[1],
                  preferred_element_type=jnp.float32).reshape(tb, L, Cout)

    # left tap: out[l] += x[l-1] @ w[0]   (row 0 sees zero padding)
    y = jnp.dot(x_bf16_2d, w_ref[0],
                preferred_element_type=jnp.float32).reshape(tb, L, Cout)
    acc = acc + jnp.where(pos >= 1, pltpu.roll(y, shift=1, axis=1), 0.0)

    # right tap: out[l] += x[l+1] @ w[2]  (row L-1 sees zero padding); L-1 == -1 mod L
    y = jnp.dot(x_bf16_2d, w_ref[2],
                preferred_element_type=jnp.float32).reshape(tb, L, Cout)
    acc = acc + jnp.where(pos <= L - 2, pltpu.roll(y, shift=L - 1, axis=1), 0.0)
    return acc


def _tile_stats(h):
    """Per-tile two-pass BN statistics over (tile_b, L): (1, 2, C) = [mean, centred SSQ]."""
    mean = jnp.mean(h, axis=(0, 1), keepdims=True)                 # (1, 1, C)
    m2 = jnp.sum((h - mean) ** 2, axis=(0, 1), keepdims=True)      # (1, 1, C)
    return jnp.concatenate([mean, m2], axis=1)                     # (1, 2, C)


# ---------------------------------------------------------------------------
# Kernels (one per pass)
# ---------------------------------------------------------------------------
def _conv1_kernel(x_ref, w1_ref, h1_ref, st1_ref):
    # x_ref: (tb, L, Cin) input dtype; w1_ref: (3, Cin, Cout) bf16
    # h1_ref: (tb, L, Cout) f32 pre-BN conv1 output; st1_ref: (1, 2, Cout) f32 stats
    tb, L, Cin = x_ref.shape
    Cout = h1_ref.shape[-1]
    x2d = x_ref[...].astype(BF16).reshape(tb * L, Cin)     # cast inside the kernel
    h = _conv3_taps(x2d, w1_ref, tb, L, Cout)              # conv bias dropped (BN-exact)
    h1_ref[...] = h
    st1_ref[...] = _tile_stats(h)


def _bn1_conv2_kernel(h1_ref, t_ref, wt_ref, bt_ref, sc1_ref, sh1_ref, w2_ref,
                      h2_ref, st2_ref):
    tb, L, Cout = h1_ref.shape
    T = t_ref.shape[-1]

    # time embedding for this tile's batch rows: relu(t @ wt + bt)
    te = jnp.dot(t_ref[...].reshape(tb, T).astype(BF16), wt_ref[...],
                 preferred_element_type=jnp.float32)
    te = jnp.maximum(te + bt_ref[...], 0.0)                              # (tb, Cout)

    # bn1 folded into one scale/shift FMA, + time-emb broadcast, ReLU (all f32)
    h = h1_ref[...] * sc1_ref[...][None] + sh1_ref[...][None]
    h = jnp.maximum(h + te[:, None, :], 0.0)

    # conv2 (bias dropped: removed exactly by training-mode BN2)
    h2 = _conv3_taps(h.astype(BF16).reshape(tb * L, Cout), w2_ref, tb, L, Cout)
    h2_ref[...] = h2
    st2_ref[...] = _tile_stats(h2)


def _bn2_residual_kernel(h2_ref, sc2_ref, sh2_ref, x_ref, *rest, has_res_conv):
    out_ref = rest[-1]
    tb, L, Cout = h2_ref.shape

    h = jnp.maximum(h2_ref[...] * sc2_ref[...][None] + sh2_ref[...][None], 0.0)

    if has_res_conv:
        wres_ref, bres_ref = rest[0], rest[1]
        Cin = x_ref.shape[-1]
        res = jnp.dot(x_ref[...].astype(BF16).reshape(tb * L, Cin), wres_ref[...],
                      preferred_element_type=jnp.float32).reshape(tb, L, Cout)
        res = res + bres_ref[...][None]
    else:
        # identity residual: no eye() matmul, exact f32 add (review item)
        res = x_ref[...].astype(jnp.float32)

    out_ref[...] = (h + res).astype(out_ref.dtype)


# ---------------------------------------------------------------------------
# Cross-tile BN statistics combine (plain JAX, ntiles x C — negligible)
# ---------------------------------------------------------------------------
def _combine_tile_stats(stats, n_per_tile):
    """Exact equal-count parallel-variance combine of per-tile (mean, centred SSQ)."""
    m = stats[:, 0, :]                                       # (nt, C)
    m2 = stats[:, 1, :]                                      # (nt, C)
    nt = stats.shape[0]
    gmean = jnp.mean(m, axis=0, keepdims=True)               # (1, C)
    gm2 = (jnp.sum(m2, axis=0, keepdims=True)
           + n_per_tile * jnp.sum((m - gmean) ** 2, axis=0, keepdims=True))
    var = gm2 / (nt * n_per_tile)
    return gmean, var


# ---------------------------------------------------------------------------
# Wrapper
# ---------------------------------------------------------------------------
def unet_block_nlc(x_nlc, t, params, *, tile_b=1, out_dtype=jnp.float32):
    """Fused UNetBlock on channels-last activations: (B, L, Cin) -> (B, L, Cout)."""
    B, L, Cin = x_nlc.shape
    T = t.shape[-1]
    Cout = params["w1"].shape[-1]
    assert B % tile_b == 0, "tile_b must divide the batch size"
    nt = B // tile_b
    n_tile = tile_b * L
    f32 = jnp.float32

    wt = params["wt"].astype(BF16)
    bt = params["bt"].astype(f32)
    w1 = params["w1"].astype(BF16)
    w2 = params["w2"].astype(BF16)
    t3 = t.reshape(B, 1, T)            # make the tiled batch axis leading; last 2 dims full

    # Safe on v5e/v6e/v7x at these tile sizes; at real shapes re-derive tile_b per
    # generation (live f32 intermediates are ~4 B * tile_b * L * Cout each, activation
    # tiles double-buffered) — roughly halve tile_b for v7x's 64 MiB physical VMEM.
    compiler_params = pltpu.CompilerParams(
        dimension_semantics=("parallel",),           # per-tile stats -> no cross-tile dep
        vmem_limit_bytes=32 * 1024 * 1024,
    )

    def tile_spec(C):
        return pl.BlockSpec((tile_b, L, C), lambda i: (i, 0, 0))

    def const_spec(shape):
        return pl.BlockSpec(shape, lambda i: (0,) * len(shape))   # block-invariant weight

    stats_spec = pl.BlockSpec((1, 2, Cout), lambda i: (i, 0, 0))
    stats_shape = jax.ShapeDtypeStruct((nt, 2, Cout), f32)
    act_shape = jax.ShapeDtypeStruct((B, L, Cout), f32)
    itemsize_x = x_nlc.dtype.itemsize

    # ---- pass 1: conv1 + per-tile BN1 stats --------------------------------------
    h1, st1 = pl.pallas_call(
        _conv1_kernel,
        grid=(nt,),
        in_specs=[tile_spec(Cin), const_spec((3, Cin, Cout))],
        out_specs=(tile_spec(Cout), stats_spec),
        out_shape=(act_shape, stats_shape),
        compiler_params=compiler_params,
        cost_estimate=pl.CostEstimate(
            flops=2 * B * L * 3 * Cin * Cout,
            transcendentals=0,
            bytes_accessed=(B * L * Cin * itemsize_x + 3 * Cin * Cout * 2
                            + B * L * Cout * 4 + nt * 2 * Cout * 4)),
    )(x_nlc, w1)

    mean1, var1 = _combine_tile_stats(st1, n_tile)
    sc1 = params["g1"].astype(f32) * lax.rsqrt(var1 + EPS)          # (1, Cout)
    sh1 = params["be1"].astype(f32) - mean1 * sc1                   # (1, Cout)

    # ---- pass 2: bn1 + time-emb + relu + conv2 + per-tile BN2 stats ---------------
    h2, st2 = pl.pallas_call(
        _bn1_conv2_kernel,
        grid=(nt,),
        in_specs=[tile_spec(Cout),
                  pl.BlockSpec((tile_b, 1, T), lambda i: (i, 0, 0)),
                  const_spec((T, Cout)), const_spec((1, Cout)),
                  const_spec((1, Cout)), const_spec((1, Cout)),
                  const_spec((3, Cout, Cout))],
        out_specs=(tile_spec(Cout), stats_spec),
        out_shape=(act_shape, stats_shape),
        compiler_params=compiler_params,
        cost_estimate=pl.CostEstimate(
            flops=2 * B * T * Cout + 2 * B * L * 3 * Cout * Cout,
            transcendentals=0,
            bytes_accessed=(2 * B * L * Cout * 4 + B * T * 4 + T * Cout * 2
                            + 3 * Cout * Cout * 2 + nt * 2 * Cout * 4)),
    )(h1, t3, wt, bt, sc1, sh1, w2)

    mean2, var2 = _combine_tile_stats(st2, n_tile)
    sc2 = params["g2"].astype(f32) * lax.rsqrt(var2 + EPS)
    sh2 = params["be2"].astype(f32) - mean2 * sc2

    # ---- pass 3: bn2 + relu + residual + store ------------------------------------
    has_res_conv = "wres" in params
    if has_res_conv:
        extra_specs = [const_spec((Cin, Cout)), const_spec((1, Cout))]
        extra_args = (params["wres"].astype(BF16), params["bres"].astype(f32))
    else:
        extra_specs, extra_args = [], ()

    out = pl.pallas_call(
        functools.partial(_bn2_residual_kernel, has_res_conv=has_res_conv),
        grid=(nt,),
        in_specs=[tile_spec(Cout), const_spec((1, Cout)), const_spec((1, Cout)),
                  tile_spec(Cin)] + extra_specs,
        out_specs=tile_spec(Cout),
        out_shape=jax.ShapeDtypeStruct((B, L, Cout), out_dtype),
        compiler_params=compiler_params,
        cost_estimate=pl.CostEstimate(
            flops=(2 * B * L * Cin * Cout if has_res_conv else 0) + 4 * B * L * Cout,
            transcendentals=0,
            bytes_accessed=(B * L * Cout * 4 + B * L * Cin * itemsize_x
                            + B * L * Cout * jnp.dtype(out_dtype).itemsize)),
    )(h2, sc2, sh2, x_nlc, *extra_args)
    return out


@jax.jit
def unet_block(x_ncl, t, params):
    """PyTorch-layout wrapper: x (B, Cin, L) NCL -> (B, Cout, L).

    The transposes are interface glue for the NCL Conv1d convention only; keep
    activations channels-last across layers and call unet_block_nlc to avoid them.
    """
    out_nlc = unet_block_nlc(jnp.transpose(x_ncl, (0, 2, 1)), t, params)
    return jnp.transpose(out_nlc, (0, 2, 1))


# ---------------------------------------------------------------------------
# Deterministic parameter construction (synthetic, matching nn.Module shapes)
# ---------------------------------------------------------------------------
def make_params(key, in_channels, out_channels, time_emb_dim):
    ks = jax.random.split(key, 8)
    s = 0.25
    p = {
        # nn.Linear(time_emb_dim, out_channels): weight (Cout, T) -> stored (T, Cout)
        "wt": s * jax.random.normal(ks[0], (time_emb_dim, out_channels), jnp.float32),
        "bt": s * jax.random.normal(ks[1], (1, out_channels), jnp.float32),
        # nn.Conv1d(Cin, Cout, 3): weight (Cout, Cin, 3) -> stored tap-major (3, Cin, Cout)
        "w1": s * jax.random.normal(ks[2], (3, in_channels, out_channels), jnp.float32),
        "b1": s * jax.random.normal(ks[3], (1, out_channels), jnp.float32),
        "w2": s * jax.random.normal(ks[4], (3, out_channels, out_channels), jnp.float32),
        "b2": s * jax.random.normal(ks[5], (1, out_channels), jnp.float32),
        # BatchNorm1d affine params
        "g1": jnp.ones((1, out_channels), jnp.float32),
        "be1": jnp.zeros((1, out_channels), jnp.float32),
        "g2": jnp.ones((1, out_channels), jnp.float32),
        "be2": jnp.zeros((1, out_channels), jnp.float32),
    }
    if in_channels != out_channels:
        # nn.Conv1d(Cin, Cout, 1) residual: weight (Cout, Cin, 1) -> stored (Cin, Cout)
        p["wres"] = s * jax.random.normal(ks[6], (in_channels, out_channels), jnp.float32)
        p["bres"] = s * jax.random.normal(ks[7], (1, out_channels), jnp.float32)
    return p


# ---------------------------------------------------------------------------
# Pure-JAX reference (independent conv via lax.conv_general_dilated)
# ---------------------------------------------------------------------------
def _bn_train(h_ncl, gamma, beta):
    mu = jnp.mean(h_ncl, axis=(0, 2), keepdims=True)
    var = jnp.mean((h_ncl - mu) ** 2, axis=(0, 2), keepdims=True)
    return (h_ncl - mu) * lax.rsqrt(var + EPS) * gamma[None, :, None] + beta[None, :, None]


def reference(x, t, p, matmul_dtype=jnp.float32):
    """Pure-JAX reference (training-mode BN, NCL layout, includes conv biases).

    matmul_dtype=bfloat16 reproduces the kernel's MXU operand precision (tight check);
    float32 is the faithful PyTorch-semantics reference.
    """
    c = lambda a: a.astype(matmul_dtype)
    te = jax.nn.relu(jnp.dot(c(t), c(p["wt"]), preferred_element_type=jnp.float32)
                     + p["bt"][0])                                  # (B, Cout)
    te = te[:, :, None]
    w1 = jnp.transpose(p["w1"], (2, 1, 0))                          # (Cout, Cin, 3)
    h = lax.conv_general_dilated(c(x), c(w1), (1,), [(1, 1)],
                                 dimension_numbers=("NCH", "OIH", "NCH"),
                                 preferred_element_type=jnp.float32)
    h = h + p["b1"][0][None, :, None]
    h = _bn_train(h, p["g1"][0], p["be1"][0])
    h = jax.nn.relu(h + te)
    w2 = jnp.transpose(p["w2"], (2, 1, 0))
    h = lax.conv_general_dilated(c(h), c(w2), (1,), [(1, 1)],
                                 dimension_numbers=("NCH", "OIH", "NCH"),
                                 preferred_element_type=jnp.float32)
    h = h + p["b2"][0][None, :, None]
    h = _bn_train(h, p["g2"][0], p["be2"][0])
    h = jax.nn.relu(h)
    if "wres" in p:
        res = jnp.einsum("co,bcl->bol", c(p["wres"]), c(x),
                         preferred_element_type=jnp.float32) + p["bres"][0][None, :, None]
    else:
        res = x.astype(jnp.float32)
    return h + res


if __name__ == "__main__":
    key = jax.random.PRNGKey(0)
    B, L, T = 2, 16, 32

    for cin, cout, tag in [(4, 8, "conv-residual"), (8, 8, "identity-residual")]:
        kx, kt, kp = jax.random.split(jax.random.fold_in(key, 100 * cin + cout), 3)
        x = jax.random.normal(kx, (B, cin, L), jnp.float32)
        t = jax.random.normal(kt, (B, T), jnp.float32)
        params = make_params(kp, cin, cout, T)

        out = jax.block_until_ready(unet_block(x, t, params))
        assert out.shape == (B, cout, L)

        # Tight check vs a reference using the same bf16 MXU operand precision.
        ref_matched = reference(x, t, params, matmul_dtype=jnp.bfloat16)
        assert jnp.allclose(out, ref_matched, rtol=1e-2, atol=1e-2), \
            f"{tag}: mismatch vs matched-precision reference"

        # Looser check vs the full-f32 PyTorch-semantics reference (only difference is
        # the bf16 cast of matmul operands inside the kernels).
        ref_f32 = reference(x, t, params)
        assert jnp.allclose(out, ref_f32, rtol=1e-1, atol=1e-1), \
            f"{tag}: mismatch vs f32 reference"

    print("KERNEL_OK")
</pallas_src>

<mosaic_0001>
module attributes {stable_mosaic.version = 11 : i64} {
  func.func @_conv1_kernel(%arg0: i32, %arg1: memref<1x16x4xf32, #tpu.memory_space<vmem>>, %arg2: memref<3x4x8xbf16, #tpu.memory_space<vmem>>, %arg3: memref<1x16x8xf32, #tpu.memory_space<vmem>>, %arg4: memref<1x2x8xf32, #tpu.memory_space<vmem>>) attributes {dimension_semantics = [#tpu.dimension_semantics<parallel>], iteration_bounds = array<i64: 2>, scalar_prefetch = 0 : i64, scratch_operands = 0 : i64, tpu.core_type = #tpu.core_type<tc>, window_params = [{transform_indices = @transform_0, window_bounds = array<i64: 1, 16, 4>}, {pipeline_mode = #tpu.pipeline_mode<synchronous>, transform_indices = @transform_1, window_bounds = array<i64: 3, 4, 8>}, {transform_indices = @transform_2, window_bounds = array<i64: 1, 16, 8>}, {transform_indices = @transform_3, window_bounds = array<i64: 1, 2, 8>}]} {
    %c0 = arith.constant 0 : index
    %c0_0 = arith.constant 0 : index
    %c0_1 = arith.constant 0 : index
    %0 = vector.load %arg1[%c0, %c0_0, %c0_1] : memref<1x16x4xf32, #tpu.memory_space<vmem>>, vector<1x16x4xf32>
    %1 = arith.truncf %0 : vector<1x16x4xf32> to vector<1x16x4xbf16>
    %2 = vector.shape_cast %1 : vector<1x16x4xbf16> to vector<16x4xbf16>
    %3 = tpu.iota {dimensions = array<i32: 1>} : vector<1x16x8xi32>
    %c1 = arith.constant 1 : index
    %c0_2 = arith.constant 0 : index
    %c0_3 = arith.constant 0 : index
    %4 = vector.load %arg2[%c1, %c0_2, %c0_3] : memref<3x4x8xbf16, #tpu.memory_space<vmem>>, vector<1x4x8xbf16>
    %5 = vector.shape_cast %4 : vector<1x4x8xbf16> to vector<4x8xbf16>
    %cst = arith.constant dense<0.000000e+00> : vector<16x8xf32>
    %6 = tpu.matmul %2, %5, %cst {dimension_numbers = #tpu.dot_dimension_numbers<[1], [0], [0], [1], [0, 0, 1, 1], [], []>} : vector<16x4xbf16>, vector<4x8xbf16>, vector<16x8xf32> -> vector<16x8xf32>
    %7 = vector.shape_cast %6 : vector<16x8xf32> to vector<1x16x8xf32>
    %c0_4 = arith.constant 0 : index
    %c0_5 = arith.constant 0 : index
    %c0_6 = arith.constant 0 : index
    %8 = vector.load %arg2[%c0_4, %c0_5, %c0_6] : memref<3x4x8xbf16, #tpu.memory_space<vmem>>, vector<1x4x8xbf16>
    %9 = vector.shape_cast %8 : vector<1x4x8xbf16> to vector<4x8xbf16>
    %cst_7 = arith.constant dense<0.000000e+00> : vector<16x8xf32>
    %10 = tpu.matmul %2, %9, %cst_7 {dimension_numbers = #tpu.dot_dimension_numbers<[1], [0], [0], [1], [0, 0, 1, 1], [], []>} : vector<16x4xbf16>, vector<4x8xbf16>, vector<16x8xf32> -> vector<16x8xf32>
    %11 = vector.shape_cast %10 : vector<16x8xf32> to vector<1x16x8xf32>
    %c1_i32 = arith.constant 1 : i32
    %12 = vector.broadcast %c1_i32 : i32 to vector<1x16x8xi32>
    %13 = arith.cmpi sge, %3, %12 : vector<1x16x8xi32>
    %c1_i32_8 = arith.constant 1 : i32
    %14 = tpu.dynamic_rotate %11 by %c1_i32_8 dim 1 : vector<1x16x8xf32>, i32 -> vector<1x16x8xf32>
    %cst_9 = arith.constant 0.000000e+00 : f32
    %15 = vector.broadcast %cst_9 : f32 to vector<1x16x8xf32>
    %16 = arith.select %13, %14, %15 : vector<1x16x8xi1>, vector<1x16x8xf32>
    %17 = arith.addf %7, %16 : vector<1x16x8xf32>
    %c2 = arith.constant 2 : index
    %c0_10 = arith.constant 0 : index
    %c0_11 = arith.constant 0 : index
    %18 = vector.load %arg2[%c2, %c0_10, %c0_11] : memref<3x4x8xbf16, #tpu.memory_space<vmem>>, vector<1x4x8xbf16>
    %19 = vector.shape_cast %18 : vector<1x4x8xbf16> to vector<4x8xbf16>
    %cst_12 = arith.constant dense<0.000000e+00> : vector<16x8xf32>
    %20 = tpu.matmul %2, %19, %cst_12 {dimension_numbers = #tpu.dot_dimension_numbers<[1], [0], [0], [1], [0, 0, 1, 1], [], []>} : vector<16x4xbf16>, vector<4x8xbf16>, vector<16x8xf32> -> vector<16x8xf32>
    %21 = vector.shape_cast %20 : vector<16x8xf32> to vector<1x16x8xf32>
    %c14_i32 = arith.constant 14 : i32
    %22 = vector.broadcast %c14_i32 : i32 to vector<1x16x8xi32>
    %23 = arith.cmpi sle, %3, %22 : vector<1x16x8xi32>
    %c15_i32 = arith.constant 15 : i32
    %24 = tpu.dynamic_rotate %21 by %c15_i32 dim 1 : vector<1x16x8xf32>, i32 -> vector<1x16x8xf32>
    %cst_13 = arith.constant 0.000000e+00 : f32
    %25 = vector.broadcast %cst_13 : f32 to vector<1x16x8xf32>
    %26 = arith.select %23, %24, %25 : vector<1x16x8xi1>, vector<1x16x8xf32>
    %27 = arith.addf %17, %26 : vector<1x16x8xf32>
    %c0_14 = arith.constant 0 : index
    %c0_15 = arith.constant 0 : index
    %c0_16 = arith.constant 0 : index
    %28 = vector.load %arg3[%c0_14, %c0_15, %c0_16] : memref<1x16x8xf32, #tpu.memory_space<vmem>>, vector<1x16x8xf32>
    tpu.vector_store %arg3[%c0_14, %c0_15, %c0_16], %27 {strides = array<i32>} : memref<1x16x8xf32, #tpu.memory_space<vmem>>, vector<1x16x8xf32>,
    %cst_17 = arith.constant dense<0.000000e+00> : vector<8xf32>
    %29 = vector.multi_reduction <add>, %27, %cst_17 [0, 1] : vector<1x16x8xf32> to vector<8xf32>
    %30 = vector.shape_cast %29 : vector<8xf32> to vector<1x1x8xf32>
    %cst_18 = arith.constant 1.600000e+01 : f32
    %31 = vector.broadcast %cst_18 : f32 to vector<1x1x8xf32>
    %32 = arith.divf %30, %31 : vector<1x1x8xf32>
    %33 = vector.broadcast %32 : vector<1x1x8xf32> to vector<1x16x8xf32>
    %34 = arith.subf %27, %33 : vector<1x16x8xf32>
    %35 = arith.mulf %34, %34 : vector<1x16x8xf32>
    %cst_19 = arith.constant dense<0.000000e+00> : vector<8xf32>
    %36 = vector.multi_reduction <add>, %35, %cst_19 [0, 1] : vector<1x16x8xf32> to vector<8xf32>
    %37 = vector.shape_cast %36 : vector<8xf32> to vector<1x1x8xf32>
    %38 = tpu.concatenate %32, %37 in 1 : vector<1x1x8xf32>, vector<1x1x8xf32> -> vector<1x2x8xf32>
    %c0_20 = arith.constant 0 : index
    %c0_21 = arith.constant 0 : index
    %c0_22 = arith.constant 0 : index
    %39 = vector.load %arg4[%c0_20, %c0_21, %c0_22] : memref<1x2x8xf32, #tpu.memory_space<vmem>>, vector<1x2x8xf32>
    tpu.vector_store %arg4[%c0_20, %c0_21, %c0_22], %38 {strides = array<i32>} : memref<1x2x8xf32, #tpu.memory_space<vmem>>, vector<1x2x8xf32>,
    return
  }
  func.func @transform_0(%arg0: i32) -> (i32, i32, i32) {
    %c0_i32 = arith.constant 0 : i32
    %c0_i32_0 = arith.constant 0 : i32
    %c0_i32_1 = arith.constant 0 : i32
    return %arg0, %c0_i32, %c0_i32_0 : i32, i32, i32
  }
  func.func @transform_1(%arg0: i32) -> (i32, i32, i32) {
    %c0_i32 = arith.constant 0 : i32
    %c0_i32_0 = arith.constant 0 : i32
    %c0_i32_1 = arith.constant 0 : i32
    %c0_i32_2 = arith.constant 0 : i32
    return %c0_i32, %c0_i32_0, %c0_i32_1 : i32, i32, i32
  }
  func.func @transform_2(%arg0: i32) -> (i32, i32, i32) {
    %c0_i32 = arith.constant 0 : i32
    %c0_i32_0 = arith.constant 0 : i32
    %c0_i32_1 = arith.constant 0 : i32
    return %arg0, %c0_i32, %c0_i32_0 : i32, i32, i32
  }
  func.func @transform_3(%arg0: i32) -> (i32, i32, i32) {
    %c0_i32 = arith.constant 0 : i32
    %c0_i32_0 = arith.constant 0 : i32
    %c0_i32_1 = arith.constant 0 : i32
    return %arg0, %c0_i32, %c0_i32_0 : i32, i32, i32
  }
}

module attributes {stable_mosaic.version = 11 : i64} {
  func.func @_bn2_residual_kernel(%arg0: i32, %arg1: memref<1x16x8xf32, #tpu.memory_space<vmem>>, %arg2: memref<1x8xf32, #tpu.memory_space<vmem>>, %arg3: memref<1x8xf32, #tpu.memory_space<vmem>>, %arg4: memref<1x16x4xf32, #tpu.memory_space<vmem>>, %arg5: memref<4x8xbf16, #tpu.memory_space<vmem>>, %arg6: memref<1x8xf32, #tpu.memory_space<vmem>>, %arg7: memref<1x16x8xf32, #tpu.memory_space<vmem>>) attributes {dimension_semantics = [#tpu.dimension_semantics<parallel>], iteration_bounds = array<i64: 2>, scalar_prefetch = 0 : i64, scratch_operands = 0 : i64, tpu.core_type = #tpu.core_type<tc>, window_params = [{transform_indices = @transform_0, window_bounds = array<i64: 1, 16, 8>}, {pipeline_mode = #tpu.pipeline_mode<synchronous>, transform_indices = @transform_1, window_bounds = array<i64: 1, 8>}, {pipeline_mode = #tpu.pipeline_mode<synchronous>, transform_indices = @transform_2, window_bounds = array<i64: 1, 8>}, {transform_indices = @transform_3, window_bounds = array<i64: 1, 16, 4>}, {pipeline_mode = #tpu.pipeline_mode<synchronous>, transform_indices = @transform_4, window_bounds = array<i64: 4, 8>}, {pipeline_mode = #tpu.pipeline_mode<synchronous>, transform_indices = @transform_5, window_bounds = array<i64: 1, 8>}, {transform_indices = @transform_6, window_bounds = array<i64: 1, 16, 8>}]} {
    %c0 = arith.constant 0 : index
    %c0_0 = arith.constant 0 : index
    %c0_1 = arith.constant 0 : index
    %0 = vector.load %arg1[%c0, %c0_0, %c0_1] : memref<1x16x8xf32, #tpu.memory_space<vmem>>, vector<1x16x8xf32>
    %c0_2 = arith.constant 0 : index
    %c0_3 = arith.constant 0 : index
    %1 = vector.load %arg2[%c0_2, %c0_3] : memref<1x8xf32, #tpu.memory_space<vmem>>, vector<1x8xf32>
    %2 = vector.shape_cast %1 : vector<1x8xf32> to vector<1x1x8xf32>
    %3 = vector.broadcast %2 : vector<1x1x8xf32> to vector<1x16x8xf32>
    %4 = arith.mulf %0, %3 : vector<1x16x8xf32>
    %c0_4 = arith.constant 0 : index
    %c0_5 = arith.constant 0 : index
    %5 = vector.load %arg3[%c0_4, %c0_5] : memref<1x8xf32, #tpu.memory_space<vmem>>, vector<1x8xf32>
    %6 = vector.shape_cast %5 : vector<1x8xf32> to vector<1x1x8xf32>
    %7 = vector.broadcast %6 : vector<1x1x8xf32> to vector<1x16x8xf32>
    %8 = arith.addf %4, %7 : vector<1x16x8xf32>
    %cst = arith.constant 0.000000e+00 : f32
    %9 = vector.broadcast %cst : f32 to vector<1x16x8xf32>
    %10 = arith.maximumf %8, %9 : vector<1x16x8xf32>
    %c0_6 = arith.constant 0 : index
    %c0_7 = arith.constant 0 : index
    %c0_8 = arith.constant 0 : index
    %11 = vector.load %arg4[%c0_6, %c0_7, %c0_8] : memref<1x16x4xf32, #tpu.memory_space<vmem>>, vector<1x16x4xf32>
    %12 = arith.truncf %11 : vector<1x16x4xf32> to vector<1x16x4xbf16>
    %13 = vector.shape_cast %12 : vector<1x16x4xbf16> to vector<16x4xbf16>
    %c0_9 = arith.constant 0 : index
    %c0_10 = arith.constant 0 : index
    %14 = vector.load %arg5[%c0_9, %c0_10] : memref<4x8xbf16, #tpu.memory_space<vmem>>, vector<4x8xbf16>
    %cst_11 = arith.constant dense<0.000000e+00> : vector<16x8xf32>
    %15 = tpu.matmul %13, %14, %cst_11 {dimension_numbers = #tpu.dot_dimension_numbers<[1], [0], [0], [1], [0, 0, 1, 1], [], []>} : vector<16x4xbf16>, vector<4x8xbf16>, vector<16x8xf32> -> vector<16x8xf32>
    %16 = vector.shape_cast %15 : vector<16x8xf32> to vector<1x16x8xf32>
    %c0_12 = arith.constant 0 : index
    %c0_13 = arith.constant 0 : index
    %17 = vector.load %arg6[%c0_12, %c0_13] : memref<1x8xf32, #tpu.memory_space<vmem>>, vector<1x8xf32>
    %18 = vector.shape_cast %17 : vector<1x8xf32> to vector<1x1x8xf32>
    %19 = vector.broadcast %18 : vector<1x1x8xf32> to vector<1x16x8xf32>
    %20 = arith.addf %16, %19 : vector<1x16x8xf32>
    %21 = arith.addf %10, %20 : vector<1x16x8xf32>
    %c0_14 = arith.constant 0 : index
    %c0_15 = arith.constant 0 : index
    %c0_16 = arith.constant 0 : index
    %22 = vector.load %arg7[%c0_14, %c0_15, %c0_16] : memref<1x16x8xf32, #tpu.memory_space<vmem>>, vector<1x16x8xf32>
    tpu.vector_store %arg7[%c0_14, %c0_15, %c0_16], %21 {strides = array<i32>} : memref<1x16x8xf32, #tpu.memory_space<vmem>>, vector<1x16x8xf32>,
    return
  }
  func.func @transform_0(%arg0: i32) -> (i32, i32, i32) {
    %c0_i32 = arith.constant 0 : i32
    %c0_i32_0 = arith.constant 0 : i32
    %c0_i32_1 = arith.constant 0 : i32
    return %arg0, %c0_i32, %c0_i32_0 : i32, i32, i32
  }
  func.func @transform_1(%arg0: i32) -> (i32, i32) {
    %c0_i32 = arith.constant 0 : i32
    %c0_i32_0 = arith.constant 0 : i32
    %c0_i32_1 = arith.constant 0 : i32
    return %c0_i32, %c0_i32_0 : i32, i32
  }
  func.func @transform_2(%arg0: i32) -> (i32, i32) {
    %c0_i32 = arith.constant 0 : i32
    %c0_i32_0 = arith.constant 0 : i32
    %c0_i32_1 = arith.constant 0 : i32
    return %c0_i32, %c0_i32_0 : i32, i32
  }
  func.func @transform_3(%arg0: i32) -> (i32, i32, i32) {
    %c0_i32 = arith.constant 0 : i32
    %c0_i32_0 = arith.constant 0 : i32
    %c0_i32_1 = arith.constant 0 : i32
    return %arg0, %c0_i32, %c0_i32_0 : i32, i32, i32
  }
  func.func @transform_4(%arg0: i32) -> (i32, i32) {
    %c0_i32 = arith.constant 0 : i32
    %c0_i32_0 = arith.constant 0 : i32
    %c0_i32_1 = arith.constant 0 : i32
    return %c0_i32, %c0_i32_0 : i32, i32
  }
  func.func @transform_5(%arg0: i32) -> (i32, i32) {
    %c0_i32 = arith.constant 0 : i32
    %c0_i32_0 = arith.constant 0 : i32
    %c0_i32_1 = arith.constant 0 : i32
    return %c0_i32, %c0_i32_0 : i32, i32
  }
  func.func @transform_6(%arg0: i32) -> (i32, i32, i32) {
    %c0_i32 = arith.constant 0 : i32
    %c0_i32_0 = arith.constant 0 : i32
    %c0_i32_1 = arith.constant 0 : i32
    return %arg0, %c0_i32, %c0_i32_0 : i32, i32, i32
  }
}

module attributes {stable_mosaic.version = 11 : i64} {
  func.func @_bn1_conv2_kernel(%arg0: i32, %arg1: memref<1x16x8xf32, #tpu.memory_space<vmem>>, %arg2: memref<1x1x32xf32, #tpu.memory_space<vmem>>, %arg3: memref<32x8xbf16, #tpu.memory_space<vmem>>, %arg4: memref<1x8xf32, #tpu.memory_space<vmem>>, %arg5: memref<1x8xf32, #tpu.memory_space<vmem>>, %arg6: memref<1x8xf32, #tpu.memory_space<vmem>>, %arg7: memref<3x8x8xbf16, #tpu.memory_space<vmem>>, %arg8: memref<1x16x8xf32, #tpu.memory_space<vmem>>, %arg9: memref<1x2x8xf32, #tpu.memory_space<vmem>>) attributes {dimension_semantics = [#tpu.dimension_semantics<parallel>], iteration_bounds = array<i64: 2>, scalar_prefetch = 0 : i64, scratch_operands = 0 : i64, tpu.core_type = #tpu.core_type<tc>, window_params = [{transform_indices = @transform_0, window_bounds = array<i64: 1, 16, 8>}, {transform_indices = @transform_1, window_bounds = array<i64: 1, 1, 32>}, {pipeline_mode = #tpu.pipeline_mode<synchronous>, transform_indices = @transform_2, window_bounds = array<i64: 32, 8>}, {pipeline_mode = #tpu.pipeline_mode<synchronous>, transform_indices = @transform_3, window_bounds = array<i64: 1, 8>}, {pipeline_mode = #tpu.pipeline_mode<synchronous>, transform_indices = @transform_4, window_bounds = array<i64: 1, 8>}, {pipeline_mode = #tpu.pipeline_mode<synchronous>, transform_indices = @transform_5, window_bounds = array<i64: 1, 8>}, {pipeline_mode = #tpu.pipeline_mode<synchronous>, transform_indices = @transform_6, window_bounds = array<i64: 3, 8, 8>}, {transform_indices = @transform_7, window_bounds = array<i64: 1, 16, 8>}, {transform_indices = @transform_8, window_bounds = array<i64: 1, 2, 8>}]} {
    %c0 = arith.constant 0 : index
    %c0_0 = arith.constant 0 : index
    %c0_1 = arith.constant 0 : index
    %0 = vector.load %arg2[%c0, %c0_0, %c0_1] : memref<1x1x32xf32, #tpu.memory_space<vmem>>, vector<1x1x32xf32>
    %1 = vector.shape_cast %0 : vector<1x1x32xf32> to vector<1x32xf32>
    %2 = arith.truncf %1 : vector<1x32xf32> to vector<1x32xbf16>
    %c0_2 = arith.constant 0 : index
    %c0_3 = arith.constant 0 : index
    %3 = vector.load %arg3[%c0_2, %c0_3] : memref<32x8xbf16, #tpu.memory_space<vmem>>, vector<32x8xbf16>
    %cst = arith.constant dense<0.000000e+00> : vector<1x8xf32>
    %4 = tpu.matmul %2, %3, %cst {dimension_numbers = #tpu.dot_dimension_numbers<[1], [0], [0], [1], [0, 0, 1, 1], [], []>} : vector<1x32xbf16>, vector<32x8xbf16>, vector<1x8xf32> -> vector<1x8xf32>
    %c0_4 = arith.constant 0 : index
    %c0_5 = arith.constant 0 : index
    %5 = vector.load %arg4[%c0_4, %c0_5] : memref<1x8xf32, #tpu.memory_space<vmem>>, vector<1x8xf32>
    %6 = arith.addf %4, %5 : vector<1x8xf32>
    %cst_6 = arith.constant 0.000000e+00 : f32
    %7 = vector.broadcast %cst_6 : f32 to vector<1x8xf32>
    %8 = arith.maximumf %6, %7 : vector<1x8xf32>
    %c0_7 = arith.constant 0 : index
    %c0_8 = arith.constant 0 : index
    %c0_9 = arith.constant 0 : index
    %9 = vector.load %arg1[%c0_7, %c0_8, %c0_9] : memref<1x16x8xf32, #tpu.memory_space<vmem>>, vector<1x16x8xf32>
    %c0_10 = arith.constant 0 : index
    %c0_11 = arith.constant 0 : index
    %10 = vector.load %arg5[%c0_10, %c0_11] : memref<1x8xf32, #tpu.memory_space<vmem>>, vector<1x8xf32>
    %11 = vector.shape_cast %10 : vector<1x8xf32> to vector<1x1x8xf32>
    %12 = vector.broadcast %11 : vector<1x1x8xf32> to vector<1x16x8xf32>
    %13 = arith.mulf %9, %12 : vector<1x16x8xf32>
    %c0_12 = arith.constant 0 : index
    %c0_13 = arith.constant 0 : index
    %14 = vector.load %arg6[%c0_12, %c0_13] : memref<1x8xf32, #tpu.memory_space<vmem>>, vector<1x8xf32>
    %15 = vector.shape_cast %14 : vector<1x8xf32> to vector<1x1x8xf32>
    %16 = vector.broadcast %15 : vector<1x1x8xf32> to vector<1x16x8xf32>
    %17 = arith.addf %13, %16 : vector<1x16x8xf32>
    %18 = vector.shape_cast %8 : vector<1x8xf32> to vector<1x1x8xf32>
    %19 = vector.broadcast %18 : vector<1x1x8xf32> to vector<1x16x8xf32>
    %20 = arith.addf %17, %19 : vector<1x16x8xf32>
    %cst_14 = arith.constant 0.000000e+00 : f32
    %21 = vector.broadcast %cst_14 : f32 to vector<1x16x8xf32>
    %22 = arith.maximumf %20, %21 : vector<1x16x8xf32>
    %23 = arith.truncf %22 : vector<1x16x8xf32> to vector<1x16x8xbf16>
    %24 = vector.shape_cast %23 : vector<1x16x8xbf16> to vector<16x8xbf16>
    %25 = tpu.iota {dimensions = array<i32: 1>} : vector<1x16x8xi32>
    %c1 = arith.constant 1 : index
    %c0_15 = arith.constant 0 : index
    %c0_16 = arith.constant 0 : index
    %26 = vector.load %arg7[%c1, %c0_15, %c0_16] : memref<3x8x8xbf16, #tpu.memory_space<vmem>>, vector<1x8x8xbf16>
    %27 = vector.shape_cast %26 : vector<1x8x8xbf16> to vector<8x8xbf16>
    %cst_17 = arith.constant dense<0.000000e+00> : vector<16x8xf32>
    %28 = tpu.matmul %24, %27, %cst_17 {dimension_numbers = #tpu.dot_dimension_numbers<[1], [0], [0], [1], [0, 0, 1, 1], [], []>} : vector<16x8xbf16>, vector<8x8xbf16>, vector<16x8xf32> -> vector<16x8xf32>
    %29 = vector.shape_cast %28 : vector<16x8xf32> to vector<1x16x8xf32>
    %c0_18 = arith.constant 0 : index
    %c0_19 = arith.constant 0 : index
    %c0_20 = arith.constant 0 : index
    %30 = vector.load %arg7[%c0_18, %c0_19, %c0_20] : memref<3x8x8xbf16, #tpu.memory_space<vmem>>, vector<1x8x8xbf16>
    %31 = vector.shape_cast %30 : vector<1x8x8xbf16> to vector<8x8xbf16>
    %cst_21 = arith.constant dense<0.000000e+00> : vector<16x8xf32>
    %32 = tpu.matmul %24, %31, %cst_21 {dimension_numbers = #tpu.dot_dimension_numbers<[1], [0], [0], [1], [0, 0, 1, 1], [], []>} : vector<16x8xbf16>, vector<8x8xbf16>, vector<16x8xf32> -> vector<16x8xf32>
    %33 = vector.shape_cast %32 : vector<16x8xf32> to vector<1x16x8xf32>
    %c1_i32 = arith.constant 1 : i32
    %34 = vector.broadcast %c1_i32 : i32 to vector<1x16x8xi32>
    %35 = arith.cmpi sge, %25, %34 : vector<1x16x8xi32>
    %c1_i32_22 = arith.constant 1 : i32
    %36 = tpu.dynamic_rotate %33 by %c1_i32_22 dim 1 : vector<1x16x8xf32>, i32 -> vector<1x16x8xf32>
    %cst_23 = arith.constant 0.000000e+00 : f32
    %37 = vector.broadcast %cst_23 : f32 to vector<1x16x8xf32>
    %38 = arith.select %35, %36, %37 : vector<1x16x8xi1>, vector<1x16x8xf32>
    %39 = arith.addf %29, %38 : vector<1x16x8xf32>
    %c2 = arith.constant 2 : index
    %c0_24 = arith.constant 0 : index
    %c0_25 = arith.constant 0 : index
    %40 = vector.load %arg7[%c2, %c0_24, %c0_25] : memref<3x8x8xbf16, #tpu.memory_space<vmem>>, vector<1x8x8xbf16>
    %41 = vector.shape_cast %40 : vector<1x8x8xbf16> to vector<8x8xbf16>
    %cst_26 = arith.constant dense<0.000000e+00> : vector<16x8xf32>
    %42 = tpu.matmul %24, %41, %cst_26 {dimension_numbers = #tpu.dot_dimension_numbers<[1], [0], [0], [1], [0, 0, 1, 1], [], []>} : vector<16x8xbf16>, vector<8x8xbf16>, vector<16x8xf32> -> vector<16x8xf32>
    %43 = vector.shape_cast %42 : vector<16x8xf32> to vector<1x16x8xf32>
    %c14_i32 = arith.constant 14 : i32
    %44 = vector.broadcast %c14_i32 : i32 to vector<1x16x8xi32>
    %45 = arith.cmpi sle, %25, %44 : vector<1x16x8xi32>
    %c15_i32 = arith.constant 15 : i32
    %46 = tpu.dynamic_rotate %43 by %c15_i32 dim 1 : vector<1x16x8xf32>, i32 -> vector<1x16x8xf32>
    %cst_27 = arith.constant 0.000000e+00 : f32
    %47 = vector.broadcast %cst_27 : f32 to vector<1x16x8xf32>
    %48 = arith.select %45, %46, %47 : vector<1x16x8xi1>, vector<1x16x8xf32>
    %49 = arith.addf %39, %48 : vector<1x16x8xf32>
    %c0_28 = arith.constant 0 : index
    %c0_29 = arith.constant 0 : index
    %c0_30 = arith.constant 0 : index
    %50 = vector.load %arg8[%c0_28, %c0_29, %c0_30] : memref<1x16x8xf32, #tpu.memory_space<vmem>>, vector<1x16x8xf32>
    tpu.vector_store %arg8[%c0_28, %c0_29, %c0_30], %49 {strides = array<i32>} : memref<1x16x8xf32, #tpu.memory_space<vmem>>, vector<1x16x8xf32>,
    %cst_31 = arith.constant dense<0.000000e+00> : vector<8xf32>
    %51 = vector.multi_reduction <add>, %49, %cst_31 [0, 1] : vector<1x16x8xf32> to vector<8xf32>
    %52 = vector.shape_cast %51 : vector<8xf32> to vector<1x1x8xf32>
    %cst_32 = arith.constant 1.600000e+01 : f32
    %53 = vector.broadcast %cst_32 : f32 to vector<1x1x8xf32>
    %54 = arith.divf %52, %53 : vector<1x1x8xf32>
    %55 = vector.broadcast %54 : vector<1x1x8xf32> to vector<1x16x8xf32>
    %56 = arith.subf %49, %55 : vector<1x16x8xf32>
    %57 = arith.mulf %56, %56 : vector<1x16x8xf32>
    %cst_33 = arith.constant dense<0.000000e+00> : vector<8xf32>
    %58 = vector.multi_reduction <add>, %57, %cst_33 [0, 1] : vector<1x16x8xf32> to vector<8xf32>
    %59 = vector.shape_cast %58 : vector<8xf32> to vector<1x1x8xf32>
    %60 = tpu.concatenate %54, %59 in 1 : vector<1x1x8xf32>, vector<1x1x8xf32> -> vector<1x2x8xf32>
    %c0_34 = arith.constant 0 : index
    %c0_35 = arith.constant 0 : index
    %c0_36 = arith.constant 0 : index
    %61 = vector.load %arg9[%c0_34, %c0_35, %c0_36] : memref<1x2x8xf32, #tpu.memory_space<vmem>>, vector<1x2x8xf32>
    tpu.vector_store %arg9[%c0_34, %c0_35, %c0_36], %60 {strides = array<i32>} : memref<1x2x8xf32, #tpu.memory_space<vmem>>, vector<1x2x8xf32>,
    return
  }
  func.func @transform_0(%arg0: i32) -> (i32, i32, i32) {
    %c0_i32 = arith.constant 0 : i32
    %c0_i32_0 = arith.constant 0 : i32
    %c0_i32_1 = arith.constant 0 : i32
    return %arg0, %c0_i32, %c0_i32_0 : i32, i32, i32
  }
  func.func @transform_1(%arg0: i32) -> (i32, i32, i32) {
    %c0_i32 = arith.constant 0 : i32
    %c0_i32_0 = arith.constant 0 : i32
    %c0_i32_1 = arith.constant 0 : i32
    return %arg0, %c0_i32, %c0_i32_0 : i32, i32, i32
  }
  func.func @transform_2(%arg0: i32) -> (i32, i32) {
    %c0_i32 = arith.constant 0 : i32
    %c0_i32_0 = arith.constant 0 : i32
    %c0_i32_1 = arith.constant 0 : i32
    return %c0_i32, %c0_i32_0 : i32, i32
  }
  func.func @transform_3(%arg0: i32) -> (i32, i32) {
    %c0_i32 = arith.constant 0 : i32
    %c0_i32_0 = arith.constant 0 : i32
    %c0_i32_1 = arith.constant 0 : i32
    return %c0_i32, %c0_i32_0 : i32, i32
  }
  func.func @transform_4(%arg0: i32) -> (i32, i32) {
    %c0_i32 = arith.constant 0 : i32
    %c0_i32_0 = arith.constant 0 : i32
    %c0_i32_1 = arith.constant 0 : i32
    return %c0_i32, %c0_i32_0 : i32, i32
  }
  func.func @transform_5(%arg0: i32) -> (i32, i32) {
    %c0_i32 = arith.constant 0 : i32
    %c0_i32_0 = arith.constant 0 : i32
    %c0_i32_1 = arith.constant 0 : i32
    return %c0_i32, %c0_i32_0 : i32, i32
  }
  func.func @transform_6(%arg0: i32) -> (i32, i32, i32) {
    %c0_i32 = arith.constant 0 : i32
    %c0_i32_0 = arith.constant 0 : i32
    %c0_i32_1 = arith.constant 0 : i32
    %c0_i32_2 = arith.constant 0 : i32
    return %c0_i32, %c0_i32_0, %c0_i32_1 : i32, i32, i32
  }
  func.func @transform_7(%arg0: i32) -> (i32, i32, i32) {
    %c0_i32 = arith.constant 0 : i32
    %c0_i32_0 = arith.constant 0 : i32
    %c0_i32_1 = arith.constant 0 : i32
    return %arg0, %c0_i32, %c0_i32_0 : i32, i32, i32
  }
  func.func @transform_8(%arg0: i32) -> (i32, i32, i32) {
    %c0_i32 = arith.constant 0 : i32
    %c0_i32_0 = arith.constant 0 : i32
    %c0_i32_1 = arith.constant 0 : i32
    return %arg0, %c0_i32, %c0_i32_0 : i32, i32, i32
  }
}

</mosaic_0001>

<bundles_post_ra>
// kernel: unet_block.3
= control target key start
LH: loop header
LB: loop body
LE: loop exit
PB: predicated region body
PF: predicated region fallthrough
CT: control target
= control target key end

     0   :  { %s553_s12 = smov 0   ;;  %s602_s0 = inlined_call_operand.vmem [shape: f32[2,16,4], index: 0, kind: input, shape index: {}]   ;;  %s603_s1 = inlined_call_operand.vmem [shape: bf16[3,4,8], index: 1, kind: input, shape index: {}]   ;;  %s604_s2 = inlined_call_operand.vmem [shape: f32[2,16,8], index: 2, kind: output, shape index: {0}]   ;;  %s605_s3 = inlined_call_operand.vmem [shape: f32[2,2,8], index: 3, kind: output, shape index: {1}]  }
   0x1 LB: > { %s470_s13 = sadd.s32 4294967295, %s529_s12   ;;  %p474_p0 = scmp.ge.s32.totalorder %s529_s12, 1  ;;  %s529_s12 = sphi %s553_s12, %s14_s12  }
   0x2   : > { %p140_p1 = scmp.lt.s32.totalorder %s529_s12, 3 }
   0x4   : > { %p141_p2 = pnand %p474_p0, %p140_p1 }
   0x5   : > { %v480_v0 = vld [vmem:[%s603_s1 + $0x2] sm:$0x3] (!%p141_p2)  ;;  %vm195_vm0 = vcmask (!%p141_p2), 1041408   ;;  %v240_v1 = vld [vmem:[%s603_s1] sm:$0x3] (!%p141_p2)  ;;  %v531_v2 = vmov (!%p141_p2), 0.0   ;;  %v186_v10 = vlaneseq (!%p141_p2) }
   0x6   : > { %144 = sbr.rel (%p141_p2) target bundleno = 285 (0x11d), region = 28  ;;  %495 = vmatprep.subr.bf16.mxu0 (!%p141_p2), %v531_v2  ;;  %v197_v3 = vsel (!%p141_p2), %vm195_vm0, %v480_v0, 0  ;;  %501 = vmatprep.subr.bf16.mxu1 (!%p141_p2), %v531_v2  ;;  %v242_v4 = vsel (!%p141_p2), %vm195_vm0, %v240_v1, 0  ;;  %p168_p3 = scmp.lt.s32.totalorder (!%p141_p2), %s470_s13, 1  ;;  %vm532_vm1 = vmmov (!%p141_p2), 0   ;;  %vm191_vm2 = vcmask (!%p141_p2), 31744  }
   0x7   : > { %496 = vmatpush3.bf16.msra.mxu0 (!%p141_p2), %v197_v3  ;;  %502 = vmatpush3.bf16.msra.mxu1 (!%p141_p2), %v242_v4  ;;  %v483_v5 = vld [vmem:[%s603_s1 + $0x4] sm:$0x3] (!%p141_p2)  ;;  %v187_v11 = vshrl.u32 (!%p141_p2), %v186_v10, 7  ;;  %vm353_vm7 = vcmask (!%p141_p2), 64512   ;;  %vm380_vm8 = vcmask (!%p141_p2), 1040384   ;;  %vm382_vm9 = vcmask (!%p141_p2), 58368  }
   0x8   : > { %497 = vmatprep.mubr.msk.bf16.mxu0 (!%p141_p2), %vm532_vm1, %v531_v2  ;;  %503 = vmatprep.mubr.msk.bf16.mxu1 (!%p141_p2), %vm532_vm1, %v531_v2  ;;  %v299_v9 = vsel (!%p141_p2), %vm195_vm0, %v483_v5, 0 }
   0x9   : > { %507 = vmatprep.subr.bf16.mxu0 (!%p141_p2), %v531_v2  ;;  %vm289_vm3 = vcmp.lt.s32.totalorder (!%p141_p2), %v187_v11, 1  ;;  %vm285_vm4 = vcmp.ge.s32.totalorder (!%p141_p2), %v187_v11, 1  ;;  %v188_v27 = vadd.s32 (!%p141_p2), 8, %v187_v11  ;;  %vm346_vm5 = vcmp.lt.s32.totalorder (!%p141_p2), %v187_v11, 7 }
   0xb   : > { %vm343_vm6 = vcmp.le.s32.totalorder (!%p141_p2), %v188_v27, 14 }
   0xd   : > { %s607_s13 = smov (!%p168_p3, %s470_s13), 1 }
   0xe   : > { %s487_s18 = sshll.u32 %s607_s13, 4  ;;  %s479_s27 = sshll.u32 %s607_s13, 1 }
   0xf   : > { %s172_s23 = scalar_lea.vmem %s602_s0, %s487_s18  ;;  %s177_s26 = scalar_lea.vmem %s604_s2, %s487_s18 }
  0x10   : > { %v183_v6 = vld [vmem:[%s172_s23] sm:$0xff]  ;;  %v184_v7 = vld [vmem:[%s172_s23 + $0x8] sm:$0xff]  ;;  %s181_s30 = scalar_lea.vmem %s605_s3, %s479_s27 }
  0x11   : > { %v185_v8 = vpack.c.bf16 %v184_v7, %v183_v6 }
  0x13   : > { %498 = vmatmul.mubr.msk.bf16.vlgmr.msra.gmra.mrb[0].mxu0 %vm191_vm2, %v185_v8  ;;  %504 = vmatmul.mubr.msk.bf16.vlgmr.msra.gmra.mrb[0].mxu1 %vm191_vm2, %v185_v8 }
  0x14   : > { %508 = vmatpush3.bf16.msra.mxu0 %v299_v9  ;;  %509 = vmatprep.mubr.msk.bf16.mxu0 %vm532_vm1, %v531_v2 }
  0x1b   : > { %510 = vmatmul.mubr.msk.bf16.vlgmr.msra.gmra.mrb[4].mxu0 %vm191_vm2, %v185_v8 }
  0xe6   : > { %v233_v12 = vpop.f32.mrb[0].mxu0  ;;  %v278_v13 = vpop.f32.mrb[0].mxu1 }
  0xe7   : > { %v287_v14 = vrot.slane %v278_v13, 7  ;;  %v499_v15 = vpop.f32.mrb[1].mxu0  ;;  %v505_v16 = vpop.f32.mrb[1].mxu1 }
  0xe8   : > { %v236_v17 = vpop.f32.mrb[2].mxu0  ;;  %v281_v18 = vpop.f32.mrb[2].mxu1 }
  0xe9   : > { %v288_v19 = vrot.slane %v281_v18, 7  ;;  %v500_v20 = vpop.f32.mrb[3].mxu0  ;;  %v506_v21 = vpop.f32.mrb[3].mxu1 }
  0xeb   : > { %v290_v22 = vsel %vm289_vm3, %v287_v14, %v288_v19  ;;  %v291_v23 = vsel %vm289_vm3, %v288_v19, %v287_v14 }
  0xec   : > { %v292_v24 = vsel %vm285_vm4, %v291_v23, 0.0  ;;  %v295_v25 = vadd.f32 %v290_v22, %v236_v17 }
  0xed   : > { %v294_v26 = vadd.f32 %v292_v24, %v233_v12 }
  0xee   : > { %v335_v28 = vpop.f32.mrb[4].mxu0 }
  0xef   : > { %v511_v29 = vpop.f32.mrb[5].mxu0  ;;  %v344_v31 = vrot.slane %v335_v28, 1 }
  0xf0   : > { %v338_v30 = vpop.f32.mrb[6].mxu0 }
  0xf1   : > { %v345_v32 = vrot.slane %v338_v30, 1  ;;  %v512_v33 = vpop.f32.mrb[7].mxu0 }
  0xf3   : > { %v347_v34 = vsel %vm346_vm5, %v344_v31, %v345_v32  ;;  %v348_v35 = vsel %vm346_vm5, %v345_v32, %v344_v31 }
  0xf4   : > { %v350_v36 = vsel %vm343_vm6, %v348_v35, 0.0  ;;  %v351_v37 = vadd.f32 %v347_v34, %v294_v26 }
  0xf5   : > { %v352_v38 = vadd.f32 %v350_v36, %v295_v25 }
  0xf6   : > { %354 = vst.msk [vmem:[%s177_s26] sm:$0xff] %vm353_vm7, %v351_v37  ;;  %v356_v39 = vsel %vm353_vm7, %v351_v37, 0.0 }
  0xf7   : > { %355 = vst.msk [vmem:[%s177_s26 + $0x8] sm:$0xff] %vm353_vm7, %v352_v38  ;;  %v357_v40 = vsel %vm353_vm7, %v352_v38, 0.0 }
  0xf8   : > { %v358_v41 = vadd.f32 %v357_v40, %v356_v39 }
  0xfa   : > { %v359_v42 = vrot.slane %v358_v41, 4 }
  0xfc   : > { %v360_v43 = vadd.f32 %v359_v42, %v358_v41 }
  0xfe   : > { %v361_v44 = vrot.slane %v360_v43, 2 }
 0x100   : > { %v362_v45 = vadd.f32 %v361_v44, %v360_v43 }
 0x102   : > { %v363_v46 = vrot.slane %v362_v45, 1 }
 0x104   : > { %v364_v47 = vadd.f32 %v363_v46, %v362_v45 }
 0x106   : > { %v366_v48 = vmul.f32 0.0625, %v364_v47 }
 0x108   : > { %v367_v49 = vsub.f32 %v351_v37, %v366_v48  ;;  %v368_v50 = vsub.f32 %v352_v38, %v366_v48 }
 0x10a   : > { %v369_v51 = vmul.f32 %v367_v49, %v367_v49  ;;  %v370_v52 = vmul.f32 %v368_v50, %v368_v50 }
 0x10c   : > { %v371_v53 = vsel %vm353_vm7, %v369_v51, 0.0  ;;  %v372_v54 = vsel %vm353_vm7, %v370_v52, 0.0 }
 0x10d   : > { %v373_v55 = vadd.f32 %v372_v54, %v371_v53 }
 0x10f   : > { %v374_v56 = vrot.slane %v373_v55, 4 }
 0x111   : > { %v375_v57 = vadd.f32 %v374_v56, %v373_v55 }
 0x113   : > { %v376_v58 = vrot.slane %v375_v57, 2 }
 0x115   : > { %v377_v59 = vadd.f32 %v376_v58, %v375_v57 }
 0x117   : > { %v378_v60 = vrot.slane %v377_v59, 1 }
 0x119   : > { %v379_v61 = vadd.f32 %v378_v60, %v377_v59 }
 0x11b   : > { %v381_v62 = vsel %vm380_vm8, %v366_v48, %v379_v61 }
 0x11c   : > { %383 = vst.msk [vmem:[%s181_s30] sm:$0x3] %vm382_vm9, %v381_v62 }
 0x11d PF: > { %s14_s12 = sadd.s32 1, %s529_s12  }
 0x11e   : > { %p11_p4 = scmp.ge.s32.totalorder %s14_s12, 4  }
 0x120   :  { %13 = sbr.rel (!%p11_p4) target bundleno = 1 (0x1), region = 72 }

// kernel: unet_block.5
= control target key start
LH: loop header
LB: loop body
LE: loop exit
PB: predicated region body
PF: predicated region fallthrough
CT: control target
= control target key end

     0   :  { %s512_s21 = smov 0   ;;  %s544_s0 = inlined_call_operand.vmem [shape: f32[2,16,8], index: 0, kind: input, shape index: {}]   ;;  %s545_s1 = inlined_call_operand.vmem [shape: f32[1,8], index: 1, kind: input, shape index: {}]   ;;  %s546_s2 = inlined_call_operand.vmem [shape: f32[1,8], index: 2, kind: input, shape index: {}]   ;;  %s547_s3 = inlined_call_operand.vmem [shape: f32[2,16,4], index: 3, kind: input, shape index: {}]   ;;  %s548_s4 = inlined_call_operand.vmem [shape: bf16[4,8], index: 4, kind: input, shape index: {}]   ;;  %s549_s5 = inlined_call_operand.vmem [shape: f32[1,8], index: 5, kind: input, shape index: {}]   ;;  %s550_s6 = inlined_call_operand.vmem [shape: f32[2,16,8], index: 6, kind: output, shape index: {}]  }
   0x1 LB: > { %s429_s22 = sadd.s32 4294967295, %s473_s21   ;;  %p433_p0 = scmp.ge.s32.totalorder %s473_s21, 1  ;;  %s473_s21 = sphi %s512_s21, %s16_s21  }
   0x2   : > { %p222_p1 = scmp.lt.s32.totalorder %s473_s21, 3 }
   0x4   : > { %p223_p2 = pnand %p433_p0, %p222_p1 }
   0x5   : > { %v298_v0 = vld [vmem:[%s548_s4] sm:$0x3] (!%p223_p2)  ;;  %vm303_vm0 = vcmask (!%p223_p2), 1041408   ;;  %p257_p3 = scmp.lt.s32.totalorder (!%p223_p2), %s429_s22, 1  ;;  %v475_v1 = vmov (!%p223_p2), 0.0   ;;  %vm476_vm1 = vmmov (!%p223_p2), 0  }
   0x6   : > { %226 = sbr.rel (%p223_p2) target bundleno = 238 (0xee), region = 44  ;;  %451 = vmatprep.subr.bf16.mxu0 (!%p223_p2), %v475_v1  ;;  %v305_v2 = vsel (!%p223_p2), %vm303_vm0, %v298_v0, 0  ;;  %453 = vmatprep.mubr.msk.bf16.mxu0 (!%p223_p2), %vm476_vm1, %v475_v1  ;;  %vm299_vm2 = vcmask (!%p223_p2), 31744   ;;  %v440_v7 = vld [vmem:[%s545_s1] ss:$0 sm:$0xff] (!%p223_p2)  ;;  %vm359_vm3 = vcmask (!%p223_p2), 64512  }
   0x7   : > { %452 = vmatpush3.bf16.msra.mxu0 (!%p223_p2), %v305_v2  ;;  %v441_v10 = vld [vmem:[%s546_s2] ss:$0 sm:$0xff] (!%p223_p2) }
   0x8   : > { %v443_v14 = vld [vmem:[%s549_s5] ss:$0 sm:$0xff] (!%p223_p2) }
   0xd   : > { %s552_s22 = smov (!%p257_p3, %s429_s22), 1 }
   0xe   : > { %s446_s25 = sshll.u32 %s552_s22, 4 }
   0xf   : > { %s266_s28 = scalar_lea.vmem %s547_s3, %s446_s25  ;;  %s261_s7 = scalar_lea.vmem %s544_s0, %s446_s25 }
  0x10   : > { %v295_v3 = vld [vmem:[%s266_s28] sm:$0xff]  ;;  %v296_v4 = vld [vmem:[%s266_s28 + $0x8] sm:$0xff]  ;;  %s271_s16 = scalar_lea.vmem %s550_s6, %s446_s25 }
  0x11   : > { %v297_v5 = vpack.c.bf16 %v296_v4, %v295_v3  ;;  %v273_v6 = vld [vmem:[%s261_s7] sm:$0xff]  ;;  %v274_v8 = vld [vmem:[%s261_s7 + $0x8] sm:$0xff] }
  0x12   : > { %v282_v9 = vmul.f32 %v440_v7, %v273_v6  ;;  %v283_v11 = vmul.f32 %v440_v7, %v274_v8 }
  0x13   : > { %454 = vmatmul.mubr.msk.bf16.vlgmr.msra.gmra.mrb[0].mxu0 %vm299_vm2, %v297_v5 }
  0x14   : > { %v291_v12 = vadd.f32 %v441_v10, %v282_v9  ;;  %v292_v13 = vadd.f32 %v441_v10, %v283_v11 }
  0x16   : > { %v293_v15 = vmax.f32 %v291_v12, 0.0  ;;  %v294_v19 = vmax.f32 %v292_v13, 0.0 }
  0xe6   : > { %v341_v16 = vpop.f32.mrb[0].mxu0 }
  0xe7   : > { %v355_v17 = vadd.f32 %v443_v14, %v341_v16  ;;  %v455_v18 = vpop.f32.mrb[1].mxu0 }
  0xe8   : > { %v344_v20 = vpop.f32.mrb[2].mxu0 }
  0xe9   : > { %v357_v21 = vadd.f32 %v355_v17, %v293_v15  ;;  %v356_v22 = vadd.f32 %v443_v14, %v344_v20  ;;  %v456_v23 = vpop.f32.mrb[3].mxu0 }
  0xeb   : > { %360 = vst.msk [vmem:[%s271_s16] sm:$0xff] %vm359_vm3, %v357_v21  ;;  %v358_v24 = vadd.f32 %v356_v22, %v294_v19 }
  0xed   : > { %361 = vst.msk [vmem:[%s271_s16 + $0x8] sm:$0xff] %vm359_vm3, %v358_v24 }
  0xee PF: > { %s16_s21 = sadd.s32 1, %s473_s21  }
  0xef   : > { %p13_p4 = scmp.ge.s32.totalorder %s16_s21, 4  }
  0xf1   :  { %15 = sbr.rel (!%p13_p4) target bundleno = 1 (0x1), region = 77 }

// kernel: unet_block.4
= control target key start
LH: loop header
LB: loop body
LE: loop exit
PB: predicated region body
PF: predicated region fallthrough
CT: control target
= control target key end

     0   :  { %s843_s27 = smov 0   ;;  %s915_s0 = inlined_call_operand.vmem [shape: f32[2,16,8], index: 0, kind: input, shape index: {}]   ;;  %s916_s1 = inlined_call_operand.vmem [shape: f32[2,1,32], index: 1, kind: input, shape index: {}]   ;;  %s917_s2 = inlined_call_operand.vmem [shape: bf16[32,8], index: 2, kind: input, shape index: {}]   ;;  %s918_s3 = inlined_call_operand.vmem [shape: f32[1,8], index: 3, kind: input, shape index: {}]   ;;  %s919_s4 = inlined_call_operand.vmem [shape: f32[1,8], index: 4, kind: input, shape index: {}]   ;;  %s920_s5 = inlined_call_operand.vmem [shape: f32[1,8], index: 5, kind: input, shape index: {}]   ;;  %s921_s6 = inlined_call_operand.vmem [shape: bf16[3,8,8], index: 6, kind: input, shape index: {}]   ;;  %s922_s7 = inlined_call_operand.vmem [shape: f32[2,16,8], index: 7, kind: output, shape index: {0}]   ;;  %s923_s8 = inlined_call_operand.vmem [shape: f32[2,2,8], index: 8, kind: output, shape index: {1}]  }
   0x1 LB: > { %s717_s28 = sadd.s32 4294967295, %s794_s27   ;;  %p721_p0 = scmp.ge.s32.totalorder %s794_s27, 1  ;;  %s794_s27 = sphi %s843_s27, %s19_s27  }
   0x2   : > { %p273_p1 = scmp.lt.s32.totalorder %s794_s27, 3 }
   0x4   : > { %p274_p2 = pnand %p721_p0, %p273_p1 }
   0x5   : > { %v786_v0 = vld [vmem:[%s917_s2] sm:$0xff] (!%p274_p2)   ;;  %v796_v1 = vmov (!%p274_p2), 0.0   ;;  %v787_v2 = vld [vmem:[%s917_s2 + $0x8] sm:$0xff] (!%p274_p2)   ;;  %vm797_vm0 = vmmov (!%p274_p2), 0   ;;  %p314_p3 = scmp.lt.s32.totalorder (!%p274_p2), %s717_s28, 1  ;;  %vm351_vm1 = vcmask (!%p274_p2), 261120   ;;  %v416_v9 = vlaneseq (!%p274_p2) }
   0x6   : > { %277 = sbr.rel (%p274_p2) target bundleno = 510 (0x1fe), region = 48  ;;  %750 = vmatprep.subr.bf16.mxu0 (!%p274_p2), %v796_v1  ;;  %758 = vmatprep.subr.bf16.mxu1 (!%p274_p2), %v796_v1  ;;  %v732_v5 = vld [vmem:[%s921_s6 + $0x4] sm:$0xf] (!%p274_p2)  ;;  %vm434_vm2 = vcmask (!%p274_p2), 1043456   ;;  %v735_v6 = vld [vmem:[%s921_s6 + $0x8] sm:$0xf] (!%p274_p2) }
   0x7   : > { %751 = vmatpush3.bf16.msra.mxu0 (!%p274_p2), %v786_v0  ;;  %754 = vmatprep.mubr.msk.bf16.mxu0 (!%p274_p2), %vm797_vm0, %v796_v1  ;;  %v436_v7 = vsel (!%p274_p2), %vm434_vm2, %v732_v5, 0  ;;  %v538_v8 = vsel (!%p274_p2), %vm434_vm2, %v735_v6, 0  ;;  %v730_v12 = vld [vmem:[%s919_s4] ss:$0 sm:$0xff] (!%p274_p2)  ;;  %v417_v13 = vshrl.u32 (!%p274_p2), %v416_v9, 7  ;;  %vm430_vm3 = vcmask (!%p274_p2), 64512  }
   0x8   : > { %752 = vmatprep.subr.bf16.mxu0 (!%p274_p2), %v796_v1  ;;  %760 = vmatprep.mubr.msk.bf16.mxu1 (!%p274_p2), %vm797_vm0, %v796_v1  ;;  %v338_v14 = vld [vmem:[%s918_s3] sm:$0x1] (!%p274_p2)  ;;  %vm618_vm8 = vcmask (!%p274_p2), 1040384   ;;  %vm620_vm9 = vcmask (!%p274_p2), 58368  }
   0x9   : > { %759 = vmatpush3.bf16.msra.mxu1 (!%p274_p2), %v436_v7  ;;  %v731_v18 = vld [vmem:[%s920_s5] ss:$0 sm:$0xff] (!%p274_p2)  ;;  %v418_v20 = vsub.s32 (!%p274_p2), 0, %v417_v13  ;;  %vm585_vm4 = vcmp.lt.s32.totalorder (!%p274_p2), %v417_v13, 7  ;;  %v427_v47 = vadd.s32 (!%p274_p2), 8, %v417_v13  ;;  %vm528_vm5 = vcmp.lt.s32.totalorder (!%p274_p2), %v417_v13, 1 }
   0xa   : > { %764 = vmatprep.subr.bf16.mxu1 (!%p274_p2), %v796_v1  ;;  %v479_v30 = vld [vmem:[%s921_s6] sm:$0xf] (!%p274_p2)  ;;  %vm524_vm6 = vcmp.ge.s32.totalorder (!%p274_p2), %v417_v13, 1 }
   0xb   : > { %753 = vmatpush3.bf16.msra.mxu0 (!%p274_p2), %v787_v2  ;;  %v481_v34 = vsel (!%p274_p2), %vm434_vm2, %v479_v30, 0  ;;  %vm582_vm7 = vcmp.le.s32.totalorder (!%p274_p2), %v427_v47, 14 }
   0xc   : > { %770 = vmatprep.subr.bf16.mxu0 (!%p274_p2), %v796_v1 }
   0xd   : > { %s925_s28 = smov (!%p314_p3, %s717_s28), 1 }
   0xe   : > { %s321_s13 = scalar_lea.vmem %s916_s1, %s925_s28  ;;  %s739_s18 = sshll.u32 %s925_s28, 4 }
   0xf   : > { %v332_v3 = vld [vmem:[%s321_s13] sm:$0x1]  ;;  %s318_s21 = scalar_lea.vmem %s915_s0, %s739_s18  ;;  %s326_s12 = scalar_lea.vmem %s922_s7, %s739_s18 }
  0x10   : > { %v333_v4 = vpack.c.bf16 %v332_v3, %v332_v3  ;;  %v396_v10 = vld [vmem:[%s318_s21] sm:$0xff]  ;;  %v397_v11 = vld [vmem:[%s318_s21 + $0x8] sm:$0xff]  ;;  %s726_s13 = sshll.u32 %s925_s28, 1 }
  0x11   : > { %v405_v15 = vmul.f32 %v730_v12, %v396_v10  ;;  %v406_v16 = vmul.f32 %v730_v12, %v397_v11  ;;  %s330_s16 = scalar_lea.vmem %s923_s8, %s726_s13 }
  0x12   : > { %755 = vmatmul.mubr.msk.bf16.vlgmr.msra.gmra.mrb[0].mxu0 %vm351_vm1, %v333_v4 }
  0x13   : > { %772 = vmatprep.mubr.msk.bf16.mxu0 %vm797_vm0, %v796_v1  ;;  %771 = vmatpush3.bf16.msra.mxu0 %v538_v8  ;;  %v414_v24 = vadd.f32 %v731_v18, %v405_v15  ;;  %v415_v25 = vadd.f32 %v731_v18, %v406_v16 }
  0xe5   : > { %v389_v17 = vpop.f32.mrb[0].mxu0 }
  0xe6   : > { %v390_v19 = vadd.f32 %v389_v17, %v338_v14  ;;  %v756_v21 = vpop.f32.mrb[1].mxu0 }
  0xe7   : > { %v392_v22 = vpop.f32.mrb[2].mxu0 }
  0xe8   : > { %v395_v23 = vmax.f32 %v390_v19, 0.0  ;;  %v757_v26 = vpop.f32.mrb[3].mxu0 }
  0xea   : > { %v419_v27 = vrot.slane %v395_v23, %v418_v20 }
  0xec   : > { %v420_v28 = vadd.f32 %v419_v27, %v414_v24  ;;  %v421_v29 = vadd.f32 %v419_v27, %v415_v25 }
  0xee   : > { %v422_v31 = vmax.f32 %v420_v28, 0.0  ;;  %v423_v32 = vmax.f32 %v421_v29, 0.0 }
  0xf0   : > { %v424_v33 = vpack.c.bf16 %v423_v32, %v422_v31 }
  0xf2   : > { %761 = vmatmul.mubr.msk.bf16.vlgmr.msra.gmra.mrb[0].mxu1 %vm430_vm3, %v424_v33  ;;  %773 = vmatmul.mubr.msk.bf16.vlgmr.msra.gmra.mrb[4].mxu0 %vm430_vm3, %v424_v33 }
  0xf3   : > { %765 = vmatpush3.bf16.msra.mxu1 %v481_v34  ;;  %766 = vmatprep.mubr.msk.bf16.mxu1 %vm797_vm0, %v796_v1 }
  0xfa   : > { %767 = vmatmul.mubr.msk.bf16.vlgmr.msra.gmra.mrb[4].mxu1 %vm430_vm3, %v424_v33 }
 0x1c5   : > { %v472_v35 = vpop.f32.mrb[0].mxu1  ;;  %v574_v36 = vpop.f32.mrb[4].mxu0 }
 0x1c6   : > { %v762_v37 = vpop.f32.mrb[1].mxu1  ;;  %v774_v38 = vpop.f32.mrb[5].mxu0  ;;  %v583_v41 = vrot.slane %v574_v36, 1 }
 0x1c7   : > { %v475_v39 = vpop.f32.mrb[2].mxu1  ;;  %v577_v40 = vpop.f32.mrb[6].mxu0 }
 0x1c8   : > { %v584_v42 = vrot.slane %v577_v40, 1  ;;  %v763_v43 = vpop.f32.mrb[3].mxu1  ;;  %v775_v44 = vpop.f32.mrb[7].mxu0 }
 0x1ca   : > { %v586_v45 = vsel %vm585_vm4, %v583_v41, %v584_v42  ;;  %v587_v46 = vsel %vm585_vm4, %v584_v42, %v583_v41 }
 0x1cb   : > { %v589_v58 = vsel %vm582_vm7, %v587_v46, 0.0 }
 0x1cd   : > { %v517_v48 = vpop.f32.mrb[4].mxu1 }
 0x1ce   : > { %v768_v49 = vpop.f32.mrb[5].mxu1  ;;  %v526_v51 = vrot.slane %v517_v48, 7 }
 0x1cf   : > { %v520_v50 = vpop.f32.mrb[6].mxu1 }
 0x1d0   : > { %v527_v52 = vrot.slane %v520_v50, 7  ;;  %v769_v53 = vpop.f32.mrb[7].mxu1 }
 0x1d2   : > { %v529_v54 = vsel %vm528_vm5, %v526_v51, %v527_v52  ;;  %v530_v55 = vsel %vm528_vm5, %v527_v52, %v526_v51 }
 0x1d3   : > { %v531_v56 = vsel %vm524_vm6, %v530_v55, 0.0  ;;  %v534_v57 = vadd.f32 %v529_v54, %v475_v39 }
 0x1d4   : > { %v533_v59 = vadd.f32 %v531_v56, %v472_v35 }
 0x1d5   : > { %v591_v60 = vadd.f32 %v589_v58, %v534_v57 }
 0x1d6   : > { %v590_v61 = vadd.f32 %v586_v45, %v533_v59 }
 0x1d7   : > { %593 = vst.msk [vmem:[%s326_s12 + $0x8] sm:$0xff] %vm430_vm3, %v591_v60  ;;  %v595_v62 = vsel %vm430_vm3, %v591_v60, 0.0 }
 0x1d8   : > { %592 = vst.msk [vmem:[%s326_s12] sm:$0xff] %vm430_vm3, %v590_v61  ;;  %v594_v63 = vsel %vm430_vm3, %v590_v61, 0.0 }
 0x1d9   : > { %v596_v0 = vadd.f32 %v595_v62, %v594_v63 }
 0x1db   : > { %v597_v1 = vrot.slane %v596_v0, 4 }
 0x1dd   : > { %v598_v2 = vadd.f32 %v597_v1, %v596_v0 }
 0x1df   : > { %v599_v3 = vrot.slane %v598_v2, 2 }
 0x1e1   : > { %v600_v4 = vadd.f32 %v599_v3, %v598_v2 }
 0x1e3   : > { %v601_v5 = vrot.slane %v600_v4, 1 }
 0x1e5   : > { %v602_v6 = vadd.f32 %v601_v5, %v600_v4 }
 0x1e7   : > { %v604_v7 = vmul.f32 0.0625, %v602_v6 }
 0x1e9   : > { %v605_v8 = vsub.f32 %v590_v61, %v604_v7  ;;  %v606_v9 = vsub.f32 %v591_v60, %v604_v7 }
 0x1eb   : > { %v607_v10 = vmul.f32 %v605_v8, %v605_v8  ;;  %v608_v11 = vmul.f32 %v606_v9, %v606_v9 }
 0x1ed   : > { %v609_v12 = vsel %vm430_vm3, %v607_v10, 0.0  ;;  %v610_v13 = vsel %vm430_vm3, %v608_v11, 0.0 }
 0x1ee   : > { %v611_v14 = vadd.f32 %v610_v13, %v609_v12 }
 0x1f0   : > { %v612_v15 = vrot.slane %v611_v14, 4 }
 0x1f2   : > { %v613_v16 = vadd.f32 %v612_v15, %v611_v14 }
 0x1f4   : > { %v614_v17 = vrot.slane %v613_v16, 2 }
 0x1f6   : > { %v615_v18 = vadd.f32 %v614_v17, %v613_v16 }
 0x1f8   : > { %v616_v19 = vrot.slane %v615_v18, 1 }
 0x1fa   : > { %v617_v20 = vadd.f32 %v616_v19, %v615_v18 }
 0x1fc   : > { %v619_v21 = vsel %vm618_vm8, %v604_v7, %v617_v20 }
 0x1fd   : > { %621 = vst.msk [vmem:[%s330_s16] sm:$0x3] %vm620_vm9, %v619_v21 }
 0x1fe PF: > { %s19_s27 = sadd.s32 1, %s794_s27  }
 0x1ff   : > { %p16_p4 = scmp.ge.s32.totalorder %s19_s27, 4  }
 0x201   :  { %18 = sbr.rel (!%p16_p4) target bundleno = 1 (0x1), region = 95 }

</bundles_post_ra>
